<compile_context>
chip_gen: v7x
topology: tpu7x:2x2x1
jax: 0.10.0
libtpu: 0.0.40
codegen_flags: <defaults>
</compile_context>

<pallas_src>
import jax
import jax.numpy as jnp
from jax.experimental import pallas as pl
from jax.experimental.pallas import tpu as pltpu


H2_PAD = 128  # layer-2 width 50 zero-padded to a full 128-lane vreg width


def danet_kernel(x_ref, w1_ref, b1_ref, w2_ref, b2_ref, w3_ref, b3_ref, o_ref):
    # GRL is the identity in the forward pass (it only flips gradients).
    x = x_ref[...]                                                     # [TB, 1024] bf16

    # Layer 1: [TB,1024] @ [1024,512], bf16 operands, f32 accumulation (MXU).
    h1 = jnp.dot(x, w1_ref[...], preferred_element_type=jnp.float32)   # [TB, 512] f32
    h1 = jnp.maximum(h1 + b1_ref[...], 0.0)                            # bias + ReLU in f32

    # Layer 2: [TB,512] @ [512,128] (50 zero-padded to 128; padded lanes stay 0).
    h2 = jnp.dot(h1.astype(jnp.bfloat16), w2_ref[...],
                 preferred_element_type=jnp.float32)                   # [TB, 128] f32
    h2 = jnp.maximum(h2 + b2_ref[...], 0.0)

    # Layer 3 as a q@k^T-style contraction over the (padded, zeroed) lane dim:
    # w3 rows are replicated 8x so the lhs is sublane-aligned; row 0 of the
    # [8, TB] result is the answer and is already lane-dense for the store.
    out8 = jax.lax.dot_general(
        w3_ref[...], h2.astype(jnp.bfloat16),
        dimension_numbers=(((1,), (1,)), ((), ())),
        preferred_element_type=jnp.float32)                            # [8, TB] f32

    o_ref[...] = (out8[0:1, :] + b3_ref[0, 0]).reshape(o_ref.shape)    # (1,1,TB)


def danet_forward(x_bf16, kernel_params, tb=1024):
    """x_bf16: [B, 1024] bf16. Returns [B, 1] f32."""
    w1, b1, w2, b2, w3_blk, b3 = kernel_params
    B, F = x_bf16.shape
    H1 = w1.shape[1]
    H2 = w2.shape[1]

    # Batch tile: 1024 rows (multiple of 128 for the MXU on all gens) for large
    # batches; for small batches round up to 16 (bf16 sublane packing) or 8.
    if B >= tb:
        TB = tb
    elif B >= 16:
        TB = ((B + 15) // 16) * 16
    else:
        TB = ((B + 7) // 8) * 8
    num_tiles = (B + TB - 1) // TB   # ragged last block: OOB rows are garbage,
                                     # row-independent, and sliced off below.

    out = pl.pallas_call(
        danet_kernel,
        out_shape=jax.ShapeDtypeStruct((num_tiles, 1, TB), jnp.float32),
        grid=(num_tiles,),
        in_specs=[
            pl.BlockSpec((TB, F), lambda i: (i, 0)),       # x tile (pipelined)
            pl.BlockSpec((F, H1), lambda i: (0, 0)),       # W1 resident in VMEM
            pl.BlockSpec((1, H1), lambda i: (0, 0)),       # b1 resident
            pl.BlockSpec((H1, H2), lambda i: (0, 0)),      # W2 resident
            pl.BlockSpec((1, H2), lambda i: (0, 0)),       # b2 resident
            pl.BlockSpec((8, H2), lambda i: (0, 0)),       # w3 rows resident
            pl.BlockSpec((1, 1), lambda i: (0, 0),
                         memory_space=pltpu.MemorySpace.SMEM),  # b3 scalar in SMEM
        ],
        # Lane-dense output slab: one (1, 1, TB) row per grid step.
        out_specs=pl.BlockSpec((1, 1, TB), lambda i: (i, 0, 0)),
        compiler_params=pltpu.CompilerParams(
            # "parallel" lets the runtime shard grid steps across TensorCores
            # on megacore parts.  TODO(synk): evaluate pltpu.CORE_PARALLEL on
            # v7x if profiling shows only one TC busy.
            dimension_semantics=("parallel",),
            vmem_limit_bytes=48 * 1024 * 1024,
        ),
    )(x_bf16, w1, b1, w2, b2, w3_blk, b3)

    # (num_tiles, 1, TB) -> (B, 1): only the tiny f32 output is reshaped/sliced;
    # garbage rows from the ragged tail are dropped here.
    return out.reshape(num_tiles * TB, 1)[:B]


def init_params(key, in_dim=1024):
    """Returns (f32_params, kernel_params).

    f32_params   : unpadded f32 [in,out] weights / [1,out] biases (reference).
    kernel_params: bf16 weights with layer-2 width zero-padded to 128, layer-3
                   weight stored as an [8, 128] replicated-row block, b3 as a
                   [1, 1] f32 scalar.
    """
    dims = [(in_dim, 512), (512, 50), (50, 1)]
    f32_params = []
    for (fan_in, fan_out) in dims:
        key, kw, kb = jax.random.split(key, 3)
        bound = 1.0 / jnp.sqrt(float(fan_in))
        w = jax.random.uniform(kw, (fan_in, fan_out), jnp.float32, -bound, bound)
        b = jax.random.uniform(kb, (1, fan_out), jnp.float32, -bound, bound)
        f32_params += [w, b]

    w1, b1, w2, b2, w3, b3 = f32_params

    # Zero-pad layer-2 output width 50 -> 128 (mathematically inert: padded
    # columns of W2/b2 are zero, so padded h2 lanes are relu(0)=0 and the
    # padded entries of the w3 row are zero as well).
    pad2 = H2_PAD - w2.shape[1]
    w2_p = jnp.pad(w2, ((0, 0), (0, pad2)))
    b2_p = jnp.pad(b2, ((0, 0), (0, pad2)))
    w3_row = jnp.pad(w3.T, ((0, 0), (0, pad2)))           # [1, 128]
    w3_blk = jnp.tile(w3_row, (8, 1))                      # [8, 128] (replicated rows)

    kernel_params = (
        w1.astype(jnp.bfloat16),
        b1,                                                # f32
        w2_p.astype(jnp.bfloat16),
        b2_p,                                              # f32
        w3_blk.astype(jnp.bfloat16),
        b3.reshape(1, 1),                                  # f32 scalar
    )
    return f32_params, kernel_params


def danet_ref_f32(x, f32_params):
    """Pure-f32 reference (unpadded weights) — mirrors the PyTorch forward."""
    w1, b1, w2, b2, w3, b3 = f32_params
    h = jnp.maximum(x @ w1 + b1, 0.0)
    h = jnp.maximum(h @ w2 + b2, 0.0)
    return h @ w3 + b3


def danet_ref_matched(x_bf16, kernel_params):
    """Reference that mirrors the kernel's bf16 casts (f32 accumulation)."""
    w1, b1, w2, b2, w3_blk, b3 = kernel_params
    hp = jax.lax.Precision.HIGHEST
    xf = x_bf16.astype(jnp.float32)
    h1 = jnp.maximum(
        jnp.dot(xf, w1.astype(jnp.float32), precision=hp) + b1, 0.0)
    h1b = h1.astype(jnp.bfloat16).astype(jnp.float32)
    h2 = jnp.maximum(
        jnp.dot(h1b, w2.astype(jnp.float32), precision=hp) + b2, 0.0)
    h2b = h2.astype(jnp.bfloat16).astype(jnp.float32)
    w3f = w3_blk[0:1].astype(jnp.float32)                  # [1, 128]
    return jnp.dot(h2b, w3f.T, precision=hp) + b3[0, 0]


if __name__ == "__main__":
    key = jax.random.PRNGKey(0)
    kx, kp = jax.random.split(key)

    B, IN = 16, 1024
    x = jax.random.normal(kx, (B, IN), jnp.float32)
    f32_params, kernel_params = init_params(kp, IN)

    x_bf16 = x.astype(jnp.bfloat16)
    out = danet_forward(x_bf16, kernel_params)
    out = jax.block_until_ready(out)
    assert out.shape == (B, 1)

    # Tight check against a reference that mirrors the kernel's precision.
    ref_m = danet_ref_matched(x_bf16, kernel_params)
    assert jnp.allclose(out, ref_m, atol=2e-3, rtol=2e-3), (
        "mismatch vs matched-precision ref")

    # Loose check against the full-f32 PyTorch-equivalent forward.
    ref_f = danet_ref_f32(x, f32_params)
    assert jnp.allclose(out, ref_f, atol=5e-2, rtol=5e-2), (
        "mismatch vs f32 ref")

    print("KERNEL_OK")
</pallas_src>

<mosaic_0001>
module attributes {stable_mosaic.version = 11 : i64} {
  func.func @danet_kernel(%arg0: i32, %arg1: memref<16x1024xbf16, #tpu.memory_space<vmem>>, %arg2: memref<1024x512xbf16, #tpu.memory_space<vmem>>, %arg3: memref<1x512xf32, #tpu.memory_space<vmem>>, %arg4: memref<512x128xbf16, #tpu.memory_space<vmem>>, %arg5: memref<1x128xf32, #tpu.memory_space<vmem>>, %arg6: memref<8x128xbf16, #tpu.memory_space<vmem>>, %arg7: memref<1x1xf32, #tpu.memory_space<smem>>, %arg8: memref<1x1x16xf32, #tpu.memory_space<vmem>>) attributes {dimension_semantics = [#tpu.dimension_semantics<parallel>], iteration_bounds = array<i64: 1>, scalar_prefetch = 0 : i64, scratch_operands = 0 : i64, tpu.core_type = #tpu.core_type<tc>, window_params = [{transform_indices = @transform_0, window_bounds = array<i64: 16, 1024>}, {pipeline_mode = #tpu.pipeline_mode<synchronous>, transform_indices = @transform_1, window_bounds = array<i64: 1024, 512>}, {pipeline_mode = #tpu.pipeline_mode<synchronous>, transform_indices = @transform_2, window_bounds = array<i64: 1, 512>}, {pipeline_mode = #tpu.pipeline_mode<synchronous>, transform_indices = @transform_3, window_bounds = array<i64: 512, 128>}, {pipeline_mode = #tpu.pipeline_mode<synchronous>, transform_indices = @transform_4, window_bounds = array<i64: 1, 128>}, {pipeline_mode = #tpu.pipeline_mode<synchronous>, transform_indices = @transform_5, window_bounds = array<i64: 8, 128>}, {transform_indices = @transform_6, window_bounds = array<i64: 1, 1>}, {transform_indices = @transform_7, window_bounds = array<i64: 1, 1, 16>}]} {
    %c0 = arith.constant 0 : index
    %c0_0 = arith.constant 0 : index
    %0 = vector.load %arg1[%c0, %c0_0] : memref<16x1024xbf16, #tpu.memory_space<vmem>>, vector<16x1024xbf16>
    %c0_1 = arith.constant 0 : index
    %c0_2 = arith.constant 0 : index
    %1 = vector.load %arg2[%c0_1, %c0_2] : memref<1024x512xbf16, #tpu.memory_space<vmem>>, vector<1024x512xbf16>
    %cst = arith.constant dense<0.000000e+00> : vector<16x512xf32>
    %2 = tpu.matmul %0, %1, %cst {dimension_numbers = #tpu.dot_dimension_numbers<[1], [0], [0], [1], [0, 0, 1, 1], [], []>} : vector<16x1024xbf16>, vector<1024x512xbf16>, vector<16x512xf32> -> vector<16x512xf32>
    %c0_3 = arith.constant 0 : index
    %c0_4 = arith.constant 0 : index
    %3 = vector.load %arg3[%c0_3, %c0_4] : memref<1x512xf32, #tpu.memory_space<vmem>>, vector<1x512xf32>
    %4 = vector.broadcast %3 : vector<1x512xf32> to vector<16x512xf32>
    %5 = arith.addf %2, %4 : vector<16x512xf32>
    %cst_5 = arith.constant 0.000000e+00 : f32
    %6 = vector.broadcast %cst_5 : f32 to vector<16x512xf32>
    %7 = arith.maximumf %5, %6 : vector<16x512xf32>
    %8 = arith.truncf %7 : vector<16x512xf32> to vector<16x512xbf16>
    %c0_6 = arith.constant 0 : index
    %c0_7 = arith.constant 0 : index
    %9 = vector.load %arg4[%c0_6, %c0_7] : memref<512x128xbf16, #tpu.memory_space<vmem>>, vector<512x128xbf16>
    %cst_8 = arith.constant dense<0.000000e+00> : vector<16x128xf32>
    %10 = tpu.matmul %8, %9, %cst_8 {dimension_numbers = #tpu.dot_dimension_numbers<[1], [0], [0], [1], [0, 0, 1, 1], [], []>} : vector<16x512xbf16>, vector<512x128xbf16>, vector<16x128xf32> -> vector<16x128xf32>
    %c0_9 = arith.constant 0 : index
    %c0_10 = arith.constant 0 : index
    %11 = vector.load %arg5[%c0_9, %c0_10] : memref<1x128xf32, #tpu.memory_space<vmem>>, vector<1x128xf32>
    %12 = vector.broadcast %11 : vector<1x128xf32> to vector<16x128xf32>
    %13 = arith.addf %10, %12 : vector<16x128xf32>
    %cst_11 = arith.constant 0.000000e+00 : f32
    %14 = vector.broadcast %cst_11 : f32 to vector<16x128xf32>
    %15 = arith.maximumf %13, %14 : vector<16x128xf32>
    %c0_12 = arith.constant 0 : index
    %c0_13 = arith.constant 0 : index
    %16 = vector.load %arg6[%c0_12, %c0_13] : memref<8x128xbf16, #tpu.memory_space<vmem>>, vector<8x128xbf16>
    %17 = arith.truncf %15 : vector<16x128xf32> to vector<16x128xbf16>
    %cst_14 = arith.constant dense<0.000000e+00> : vector<8x16xf32>
    %18 = tpu.matmul %16, %17, %cst_14 {dimension_numbers = #tpu.dot_dimension_numbers<[1], [1], [0], [0], [0, 0, 1, 0], [], []>} : vector<8x128xbf16>, vector<16x128xbf16>, vector<8x16xf32> -> vector<8x16xf32>
    %19 = vector.extract_strided_slice %18 {offsets = [0, 0], sizes = [1, 16], strides = [1, 1]} : vector<8x16xf32> to vector<1x16xf32>
    %c0_15 = arith.constant 0 : index
    %c0_16 = arith.constant 0 : index
    %20 = memref.load %arg7[%c0_15, %c0_16] : memref<1x1xf32, #tpu.memory_space<smem>>
    %21 = vector.broadcast %20 : f32 to vector<1x16xf32>
    %22 = arith.addf %19, %21 : vector<1x16xf32>
    %23 = vector.shape_cast %22 : vector<1x16xf32> to vector<1x1x16xf32>
    %c0_17 = arith.constant 0 : index
    %c0_18 = arith.constant 0 : index
    %c0_19 = arith.constant 0 : index
    %24 = vector.load %arg8[%c0_17, %c0_18, %c0_19] : memref<1x1x16xf32, #tpu.memory_space<vmem>>, vector<1x1x16xf32>
    tpu.vector_store %arg8[%c0_17, %c0_18, %c0_19], %23 {strides = array<i32>} : memref<1x1x16xf32, #tpu.memory_space<vmem>>, vector<1x1x16xf32>,
    return
  }
  func.func @transform_0(%arg0: i32) -> (i32, i32) {
    %c0_i32 = arith.constant 0 : i32
    %c0_i32_0 = arith.constant 0 : i32
    return %arg0, %c0_i32 : i32, i32
  }
  func.func @transform_1(%arg0: i32) -> (i32, i32) {
    %c0_i32 = arith.constant 0 : i32
    %c0_i32_0 = arith.constant 0 : i32
    %c0_i32_1 = arith.constant 0 : i32
    return %c0_i32, %c0_i32_0 : i32, i32
  }
  func.func @transform_2(%arg0: i32) -> (i32, i32) {
    %c0_i32 = arith.constant 0 : i32
    %c0_i32_0 = arith.constant 0 : i32
    %c0_i32_1 = arith.constant 0 : i32
    return %c0_i32, %c0_i32_0 : i32, i32
  }
  func.func @transform_3(%arg0: i32) -> (i32, i32) {
    %c0_i32 = arith.constant 0 : i32
    %c0_i32_0 = arith.constant 0 : i32
    %c0_i32_1 = arith.constant 0 : i32
    return %c0_i32, %c0_i32_0 : i32, i32
  }
  func.func @transform_4(%arg0: i32) -> (i32, i32) {
    %c0_i32 = arith.constant 0 : i32
    %c0_i32_0 = arith.constant 0 : i32
    %c0_i32_1 = arith.constant 0 : i32
    return %c0_i32, %c0_i32_0 : i32, i32
  }
  func.func @transform_5(%arg0: i32) -> (i32, i32) {
    %c0_i32 = arith.constant 0 : i32
    %c0_i32_0 = arith.constant 0 : i32
    %c0_i32_1 = arith.constant 0 : i32
    return %c0_i32, %c0_i32_0 : i32, i32
  }
  func.func @transform_6(%arg0: i32) -> (i32, i32) {
    %c0_i32 = arith.constant 0 : i32
    %c0_i32_0 = arith.constant 0 : i32
    %c0_i32_1 = arith.constant 0 : i32
    return %c0_i32, %c0_i32_0 : i32, i32
  }
  func.func @transform_7(%arg0: i32) -> (i32, i32, i32) {
    %c0_i32 = arith.constant 0 : i32
    %c0_i32_0 = arith.constant 0 : i32
    %c0_i32_1 = arith.constant 0 : i32
    return %arg0, %c0_i32, %c0_i32_0 : i32, i32, i32
  }
}

</mosaic_0001>

<bundles_post_ra>
// kernel: tpu_custom_call.1
= control target key start
LH: loop header
LB: loop body
LE: loop exit
PB: predicated region body
PF: predicated region fallthrough
CT: control target
= control target key end

     0   :  { %13 = vsyncpa [#allocation4], 0  ;;  %s3481_s0 = inlined_call_operand.hbm [shape: bf16[16,1024], index: 0, kind: input, shape index: {}]   ;;  %s3482_s1 = inlined_call_operand.hbm [shape: bf16[1024,512], index: 1, kind: input, shape index: {}]   ;;  %s3483_s2 = inlined_call_operand.vmem [shape: f32[1,512], index: 2, kind: input, shape index: {}]   ;;  %s3484_s3 = inlined_call_operand.hbm [shape: bf16[512,128], index: 3, kind: input, shape index: {}]   ;;  %s3485_s4 = inlined_call_operand.vmem [shape: f32[1,128], index: 4, kind: input, shape index: {}]   ;;  %s3486_s5 = inlined_call_operand.vmem [shape: bf16[8,128], index: 5, kind: input, shape index: {}]   ;;  %s3487_s6 = inlined_call_operand.<no memory space> [shape: f32[1,1], index: 6, kind: input, shape index: {}]   ;;  %s3488_s7 = inlined_call_operand.hbm [shape: f32[1,1,16], index: 7, kind: output, shape index: {}]  }
   0x1   :  { %14 = vsyncpa [#allocation7], 0 }
   0x2   :  { %15 = vsyncpa [#allocation5], 0  ;;  %s3345_s24 = smov [#allocation6]   ;;  %s3251_s28 = scalar_lea.hbm %s3482_s1, 32768 }
   0x3   :  { %s33_s25 = sshll.u32 %s3345_s24, 4  ;;  %p3252_p0 = scmp.ne.s32.totalorder %s3482_s1, %s3251_s28  ;;  %s34_s25 = int_to_ptr.vmem [resolvable:$true] %s33_s25 }
   0x4   :  { %p3255_p1 = scmp.lt.u32.totalorder %s3251_s28, %s3482_s1 }
   0x6   :  { %p3257_p2 = pnand %p3255_p1, %p3252_p0 }
   0x8   :  { %3260 = shalt.err (!%p3257_p2)
}
   0x9   :  { %s3261_s10 = scalar_lea.vmem %s34_s25, 32768  ;;  %p3266_p4 = scmp.lt.s32.totalorder %s34_s25, %s34_s25 }
   0xa   :  { %p3262_p3 = scmp.ne.s32.totalorder %s34_s25, %s3261_s10  ;;  %p3267_p5 = scmp.lt.s32.totalorder %s3261_s10, %s3261_s10 }
   0xc   :  { %p3268_p6 = por %p3267_p5, %p3266_p4 }
   0xe   :  { %p3269_p7 = pnand %p3268_p6, %p3262_p3 }
  0x10   :  { %3272 = shalt.err (!%p3269_p7)
}
  0x11   :  { %s3346_s11 = smov 256   ;;  %s3347_s12 = smov 16  }
  0x12   :  { %39 = dma.hbm_to_vmem [thread:$0]  %s3482_s1, 32768, %s34_s25, [#allocation7], %s3346_s11, %s3346_s11, %s3347_s12  }
  0x13   :  { %s3348_s15 = smov [#allocation3]   ;;  %s3273_s19 = scalar_lea.hbm %s3481_s0, 1024 }
  0x14   :  { %s21_s16 = sshll.u32 %s3348_s15, 4  ;;  %p3274_p8 = scmp.ne.s32.totalorder %s3481_s0, %s3273_s19  ;;  %s22_s16 = int_to_ptr.vmem [resolvable:$true] %s21_s16 }
  0x15   :  { %p3277_p9 = scmp.lt.u32.totalorder %s3273_s19, %s3481_s0 }
  0x17   :  { %p3279_p10 = pnand %p3277_p9, %p3274_p8 }
  0x19   :  { %3282 = shalt.err (!%p3279_p10)
}
  0x1a   :  { %s3283_s24 = scalar_lea.vmem %s22_s16, 1024  ;;  %p3288_p12 = scmp.lt.s32.totalorder %s22_s16, %s22_s16 }
  0x1b   :  { %p3284_p11 = scmp.ne.s32.totalorder %s22_s16, %s3283_s24  ;;  %p3289_p13 = scmp.lt.s32.totalorder %s3283_s24, %s3283_s24 }
  0x1d   :  { %p3290_p0 = por %p3289_p13, %p3288_p12 }
  0x1f   :  { %p3291_p1 = pnand %p3290_p0, %p3284_p11 }
  0x21   :  { %3294 = shalt.err (!%p3291_p1)
}
  0x22   :  { %s3349_s1 = smov 512   ;;  %s3350_s25 = smov 32  }
  0x23   :  { %27 = dma.hbm_to_vmem [thread:$0]  %s3481_s0, 1024, %s22_s16, [#allocation4], %s3349_s1, %s3349_s1, %s3350_s25  }
  0x24   :  { %s3351_s28 = smov [#allocation8]   ;;  %s3295_s9 = scalar_lea.hbm %s3484_s3, 4096 }
  0x25   :  { %s47_s29 = sshll.u32 %s3351_s28, 4  ;;  %p3296_p2 = scmp.ne.s32.totalorder %s3484_s3, %s3295_s9  ;;  %s48_s29 = int_to_ptr.vmem [resolvable:$true] %s47_s29 }
  0x26   :  { %p3299_p3 = scmp.lt.u32.totalorder %s3295_s9, %s3484_s3 }
  0x28   :  { %p3301_p4 = pnand %p3299_p3, %p3296_p2 }
  0x2a   :  { %3304 = shalt.err (!%p3301_p4)
}
  0x2b   :  { %s3305_s14 = scalar_lea.vmem %s48_s29, 4096  ;;  %p3310_p6 = scmp.lt.s32.totalorder %s48_s29, %s48_s29 }
  0x2c   :  { %p3306_p5 = scmp.ne.s32.totalorder %s48_s29, %s3305_s14  ;;  %p3311_p7 = scmp.lt.s32.totalorder %s3305_s14, %s3305_s14 }
  0x2e   :  { %p3312_p8 = por %p3311_p7, %p3310_p6 }
  0x30   :  { %p3313_p9 = pnand %p3312_p8, %p3306_p5 }
  0x32   :  { %3316 = shalt.err (!%p3313_p9)
}
  0x33   :  { %s3352_s0 = smov 64   ;;  %s3353_s15 = smov 4  }
  0x34   :  { %53 = dma.hbm_to_vmem [thread:$0]  %s3484_s3, 4096, %s48_s29, [#allocation7], %s3352_s0, %s3352_s0, %s3353_s15  }
  0x35   :  { %3339 = dma.done.wait [#allocation4], 1024  }
  0x36   :  { %3340 = vsyncadd [#allocation4], 4294966272 }
  0x37   :  { %3341 = dma.done.wait [#allocation7], 36864  }
  0x38   :  { %3342 = vsyncadd [#allocation7], 4294930432  ;;  %v2835_v0 = vld [vmem:[#allocation6 + $0x4] ss:$16 sps:$4 sm:$0xff]   ;;  %v2837_v1 = vld [vmem:[#allocation6 + $0xc] ss:$16 sps:$4 sm:$0xff]  }
  0x39   :  { %1676 = vmatprep.subr.bf16.mxu0 %v2835_v0  ;;  %v2839_v2 = vld [vmem:[#allocation6] ss:$16 sps:$4 sm:$0xff]   ;;  %v2840_v3 = vld [vmem:[#allocation6 + $0x8] ss:$16 sps:$4 sm:$0xff]   ;;  %1848 = vmatprep.subr.bf16.mxu1 %v2837_v1  ;;  %v2841_v4 = vld [vmem:[#allocation6 + $0x24] ss:$16 sps:$4 sm:$0xff]  }
  0x3a   :  { %1677 = vmatpush1.bf16.msra.mxu0 %v2839_v2  ;;  %1849 = vmatpush1.bf16.msra.mxu1 %v2840_v3  ;;  %v2843_v5 = vld [vmem:[#allocation6 + $0x2c] ss:$16 sps:$4 sm:$0xff]   ;;  %v2845_v6 = vld [vmem:[#allocation6 + $0x20] ss:$16 sps:$4 sm:$0xff]   ;;  %v2846_v7 = vld [vmem:[#allocation6 + $0x28] ss:$16 sps:$4 sm:$0xff]  }
  0x3b   :  { %1678 = vmatprep.subr.bf16.mxu0 %v2841_v4  ;;  %1850 = vmatprep.subr.bf16.mxu1 %v2843_v5  ;;  %v2847_v8 = vld [vmem:[#allocation6 + $0x44] ss:$16 sps:$4 sm:$0xff]   ;;  %v2849_v9 = vld [vmem:[#allocation6 + $0x4c] ss:$16 sps:$4 sm:$0xff]   ;;  %v2851_v10 = vld [vmem:[#allocation6 + $0x40] ss:$16 sps:$4 sm:$0xff]  }
  0x3c   :  { %v2852_v11 = vld [vmem:[#allocation6 + $0x48] ss:$16 sps:$4 sm:$0xff]   ;;  %v2853_v12 = vld [vmem:[#allocation6 + $0x64] ss:$16 sps:$4 sm:$0xff]   ;;  %v2855_v13 = vld [vmem:[#allocation6 + $0x6c] ss:$16 sps:$4 sm:$0xff]  }
  0x3d   :  { %v2857_v14 = vld [vmem:[#allocation6 + $0x60] ss:$16 sps:$4 sm:$0xff]   ;;  %v2858_v15 = vld [vmem:[#allocation6 + $0x68] ss:$16 sps:$4 sm:$0xff]   ;;  %v2859_v16 = vld [vmem:[#allocation6 + $0x84] ss:$16 sps:$4 sm:$0xff]  }
  0x3e   :  { %1679 = vmatpush1.bf16.msra.mxu0 %v2845_v6  ;;  %1851 = vmatpush1.bf16.msra.mxu1 %v2846_v7  ;;  %v2861_v17 = vld [vmem:[#allocation6 + $0x8c] ss:$16 sps:$4 sm:$0xff]   ;;  %v2863_v18 = vld [vmem:[#allocation6 + $0x80] ss:$16 sps:$4 sm:$0xff]   ;;  %v2864_v19 = vld [vmem:[#allocation6 + $0x88] ss:$16 sps:$4 sm:$0xff]  }
  0x3f   :  { %1680 = vmatprep.subr.bf16.mxu0 %v2847_v8  ;;  %1852 = vmatprep.subr.bf16.mxu1 %v2849_v9  ;;  %v2865_v20 = vld [vmem:[#allocation6 + $0xa4] ss:$16 sps:$4 sm:$0xff]   ;;  %v2867_v21 = vld [vmem:[#allocation6 + $0xac] ss:$16 sps:$4 sm:$0xff]   ;;  %v2869_v22 = vld [vmem:[#allocation6 + $0xa0] ss:$16 sps:$4 sm:$0xff]  }
  0x40   :  { %v2870_v23 = vld [vmem:[#allocation6 + $0xa8] ss:$16 sps:$4 sm:$0xff]   ;;  %v2871_v24 = vld [vmem:[#allocation6 + $0xc4] ss:$16 sps:$4 sm:$0xff]   ;;  %v2873_v25 = vld [vmem:[#allocation6 + $0xcc] ss:$16 sps:$4 sm:$0xff]  }
  0x41   :  { %v2875_v26 = vld [vmem:[#allocation6 + $0xc0] ss:$16 sps:$4 sm:$0xff]   ;;  %v2876_v27 = vld [vmem:[#allocation6 + $0xc8] ss:$16 sps:$4 sm:$0xff]   ;;  %v2877_v28 = vld [vmem:[#allocation6 + $0xe4] ss:$16 sps:$4 sm:$0xff]  }
  0x42   :  { %1681 = vmatpush1.bf16.msra.mxu0 %v2851_v10  ;;  %1853 = vmatpush1.bf16.msra.mxu1 %v2852_v11  ;;  %v2879_v29 = vld [vmem:[#allocation6 + $0xec] ss:$16 sps:$4 sm:$0xff]   ;;  %v2881_v30 = vld [vmem:[#allocation6 + $0xe0] ss:$16 sps:$4 sm:$0xff]   ;;  %v2882_v31 = vld [vmem:[#allocation6 + $0xe8] ss:$16 sps:$4 sm:$0xff]  }
  0x43   :  { %1682 = vmatprep.subr.bf16.mxu0 %v2853_v12  ;;  %1854 = vmatprep.subr.bf16.mxu1 %v2855_v13  ;;  %v2883_v32 = vld [vmem:[#allocation6 + $0x104] ss:$16 sps:$4 sm:$0xff]   ;;  %v2885_v33 = vld [vmem:[#allocation6 + $0x10c] ss:$16 sps:$4 sm:$0xff]   ;;  %v2887_v34 = vld [vmem:[#allocation6 + $0x100] ss:$16 sps:$4 sm:$0xff]  }
  0x44   :  { %v2888_v35 = vld [vmem:[#allocation6 + $0x108] ss:$16 sps:$4 sm:$0xff]   ;;  %v2889_v36 = vld [vmem:[#allocation6 + $0x124] ss:$16 sps:$4 sm:$0xff]   ;;  %v2891_v37 = vld [vmem:[#allocation6 + $0x12c] ss:$16 sps:$4 sm:$0xff]  }
  0x45   :  { %v2893_v38 = vld [vmem:[#allocation6 + $0x120] ss:$16 sps:$4 sm:$0xff]   ;;  %v2894_v39 = vld [vmem:[#allocation6 + $0x128] ss:$16 sps:$4 sm:$0xff]   ;;  %v2895_v40 = vld [vmem:[#allocation6 + $0x144] ss:$16 sps:$4 sm:$0xff]  }
  0x46   :  { %1683 = vmatpush1.bf16.msra.mxu0 %v2857_v14  ;;  %1855 = vmatpush1.bf16.msra.mxu1 %v2858_v15  ;;  %v2897_v41 = vld [vmem:[#allocation6 + $0x14c] ss:$16 sps:$4 sm:$0xff]   ;;  %v2899_v42 = vld [vmem:[#allocation6 + $0x140] ss:$16 sps:$4 sm:$0xff]   ;;  %v2900_v43 = vld [vmem:[#allocation6 + $0x148] ss:$16 sps:$4 sm:$0xff]  }
  0x47   :  { %1684 = vmatprep.subr.bf16.mxu0 %v2859_v16  ;;  %1856 = vmatprep.subr.bf16.mxu1 %v2861_v17  ;;  %v2901_v44 = vld [vmem:[#allocation6 + $0x164] ss:$16 sps:$4 sm:$0xff]   ;;  %v2903_v45 = vld [vmem:[#allocation6 + $0x16c] ss:$16 sps:$4 sm:$0xff]   ;;  %v2905_v48 = vld [vmem:[#allocation6 + $0x160] ss:$16 sps:$4 sm:$0xff]  }
  0x48   :  { %v70_v46 = vld [vmem:[#allocation3] sm:$0xff]  ;;  %v2906_v49 = vld [vmem:[#allocation6 + $0x168] ss:$16 sps:$4 sm:$0xff]   ;;  %v2909_v52 = vld [vmem:[#allocation6 + $0x18c] ss:$16 sps:$4 sm:$0xff]   ;;  %vm3355_vm0 = vmmov 0  }
  0x49   :  { %v74_v47 = vld [vmem:[#allocation3 + $0x20] sm:$0xff]  ;;  %v2912_v54 = vld [vmem:[#allocation6 + $0x188] ss:$16 sps:$4 sm:$0xff]   ;;  %v2915_v56 = vld [vmem:[#allocation6 + $0x1ac] ss:$16 sps:$4 sm:$0xff]   ;;  %s3356_s23 = smov [#allocation9]  }
  0x4a   :  { %1685 = vmatpush1.bf16.msra.mxu0 %v2863_v18  ;;  %1857 = vmatpush1.bf16.msra.mxu1 %v2864_v19  ;;  %v2443_v50 = vcombine.high %v70_v46, %v74_v47  ;;  %v2907_v51 = vld [vmem:[#allocation6 + $0x184] ss:$16 sps:$4 sm:$0xff]   ;;  %v2911_v53 = vld [vmem:[#allocation6 + $0x180] ss:$16 sps:$4 sm:$0xff]   ;;  %v2918_v58 = vld [vmem:[#allocation6 + $0x1a8] ss:$16 sps:$4 sm:$0xff]   ;;  %v2442_v5 = vcombine.low %v70_v46, %v74_v47 }
  0x4b   :  { %1686 = vmatprep.subr.bf16.mxu0 %v2865_v20  ;;  %1858 = vmatprep.subr.bf16.mxu1 %v2867_v21  ;;  %v2913_v55 = vld [vmem:[#allocation6 + $0x1a4] ss:$16 sps:$4 sm:$0xff]   ;;  %v2917_v57 = vld [vmem:[#allocation6 + $0x1a0] ss:$16 sps:$4 sm:$0xff]   ;;  %v2921_v60 = vld [vmem:[#allocation6 + $0x1cc] ss:$16 sps:$4 sm:$0xff]  }
  0x4c   :  { %1708 = vmatprep.mubr.bf16.mxu0 %v2443_v50  ;;  %1880 = vmatprep.mubr.bf16.mxu1 %v2443_v50  ;;  %v2919_v59 = vld [vmem:[#allocation6 + $0x1c4] ss:$16 sps:$4 sm:$0xff]   ;;  %v2923_v61 = vld [vmem:[#allocation6 + $0x1c0] ss:$16 sps:$4 sm:$0xff]   ;;  %v2924_v62 = vld [vmem:[#allocation6 + $0x1c8] ss:$16 sps:$4 sm:$0xff]  }
  0x4d   :  { %v2925_v63 = vld [vmem:[#allocation6 + $0x1e4] ss:$16 sps:$4 sm:$0xff]   ;;  %v2927_v0 = vld [vmem:[#allocation6 + $0x1ec] ss:$16 sps:$4 sm:$0xff]   ;;  %v2929_v1 = vld [vmem:[#allocation6 + $0x1e0] ss:$16 sps:$4 sm:$0xff]  }
  0x4e   :  { %1687 = vmatpush1.bf16.msra.mxu0 %v2869_v22  ;;  %1859 = vmatpush1.bf16.msra.mxu1 %v2870_v23  ;;  %v2930_v2 = vld [vmem:[#allocation6 + $0x1e8] ss:$16 sps:$4 sm:$0xff]   ;;  %v2933_v3 = vld [vmem:[#allocation6 + $0x204] ss:$16 sps:$4 sm:$0xff]   ;;  %v2936_v4 = vld [vmem:[#allocation6 + $0x20c] ss:$16 sps:$4 sm:$0xff]  }
  0x4f   :  { %1688 = vmatprep.subr.bf16.mxu0 %v2871_v24  ;;  %1860 = vmatprep.subr.bf16.mxu1 %v2873_v25  ;;  %v2931_v6 = vld [vmem:[#allocation6 + $0x200] ss:$16 sps:$4 sm:$0xff]   ;;  %v2934_v7 = vld [vmem:[#allocation6 + $0x208] ss:$16 sps:$4 sm:$0xff]   ;;  %v2939_v8 = vld [vmem:[#allocation6 + $0x224] ss:$16 sps:$4 sm:$0xff]  }
  0x50   :  { %v2942_v9 = vld [vmem:[#allocation6 + $0x22c] ss:$16 sps:$4 sm:$0xff]   ;;  %v2937_v10 = vld [vmem:[#allocation6 + $0x220] ss:$16 sps:$4 sm:$0xff]   ;;  %v2940_v11 = vld [vmem:[#allocation6 + $0x228] ss:$16 sps:$4 sm:$0xff]  }
  0x51   :  { %v2945_v12 = vld [vmem:[#allocation6 + $0x244] ss:$16 sps:$4 sm:$0xff]   ;;  %v2948_v13 = vld [vmem:[#allocation6 + $0x24c] ss:$16 sps:$4 sm:$0xff]   ;;  %v2943_v14 = vld [vmem:[#allocation6 + $0x240] ss:$16 sps:$4 sm:$0xff]  }
  0x52   :  { %1689 = vmatpush1.bf16.msra.mxu0 %v2875_v26  ;;  %1861 = vmatpush1.bf16.msra.mxu1 %v2876_v27  ;;  %v2946_v15 = vld [vmem:[#allocation6 + $0x248] ss:$16 sps:$4 sm:$0xff]   ;;  %v2951_v16 = vld [vmem:[#allocation6 + $0x264] ss:$16 sps:$4 sm:$0xff]   ;;  %v2954_v17 = vld [vmem:[#allocation6 + $0x26c] ss:$16 sps:$4 sm:$0xff]  }
  0x53   :  { %1690 = vmatprep.subr.bf16.mxu0 %v2877_v28  ;;  %1862 = vmatprep.subr.bf16.mxu1 %v2879_v29  ;;  %v2949_v18 = vld [vmem:[#allocation6 + $0x260] ss:$16 sps:$4 sm:$0xff]   ;;  %v2952_v19 = vld [vmem:[#allocation6 + $0x268] ss:$16 sps:$4 sm:$0xff]   ;;  %v2957_v20 = vld [vmem:[#allocation6 + $0x284] ss:$16 sps:$4 sm:$0xff]  }
  0x54   :  { %v2960_v21 = vld [vmem:[#allocation6 + $0x28c] ss:$16 sps:$4 sm:$0xff]   ;;  %v2955_v22 = vld [vmem:[#allocation6 + $0x280] ss:$16 sps:$4 sm:$0xff]   ;;  %v2958_v23 = vld [vmem:[#allocation6 + $0x288] ss:$16 sps:$4 sm:$0xff]  }
  0x55   :  { %v2963_v24 = vld [vmem:[#allocation6 + $0x2a4] ss:$16 sps:$4 sm:$0xff]   ;;  %v2966_v25 = vld [vmem:[#allocation6 + $0x2ac] ss:$16 sps:$4 sm:$0xff]   ;;  %v2961_v26 = vld [vmem:[#allocation6 + $0x2a0] ss:$16 sps:$4 sm:$0xff]  }
  0x56   :  { %1691 = vmatpush1.bf16.msra.mxu0 %v2881_v30  ;;  %1863 = vmatpush1.bf16.msra.mxu1 %v2882_v31  ;;  %v2964_v27 = vld [vmem:[#allocation6 + $0x2a8] ss:$16 sps:$4 sm:$0xff]   ;;  %v2969_v28 = vld [vmem:[#allocation6 + $0x2c4] ss:$16 sps:$4 sm:$0xff]   ;;  %v2972_v29 = vld [vmem:[#allocation6 + $0x2cc] ss:$16 sps:$4 sm:$0xff]  }
  0x57   :  { %1692 = vmatprep.subr.bf16.mxu0 %v2883_v32  ;;  %1864 = vmatprep.subr.bf16.mxu1 %v2885_v33  ;;  %v3433_v30 = vld [vmem:[#allocation3 + $0x8] sm:$0xff]  ;;  %v2967_v32 = vld [vmem:[#allocation6 + $0x2c0] ss:$16 sps:$4 sm:$0xff]   ;;  %v2993_v47 = vld [vmem:[#allocation6 + $0x344] ss:$16 sps:$4 sm:$0xff]   ;;  %s2432_s24 = sshll.u32 %s3356_s23, 4  ;;  %s2433_s24 = int_to_ptr.vmem [resolvable:$true] %s2432_s24 }
  0x58   :  { %v3435_v31 = vld [vmem:[#allocation3 + $0x28] sm:$0xff]  ;;  %vm2424_vm1 = vcmask 122880   ;;  %s3317_s1 = scalar_lea.vmem %s2433_s24, 16  ;;  %s3321_s25 = scalar_lea.vmem %s2433_s24, 32 }
  0x59   :  { %v2970_v33 = vld [vmem:[#allocation6 + $0x2c8] ss:$16 sps:$4 sm:$0xff]   ;;  %p3318_p10 = scmp.ne.s32.totalorder %s2433_s24, %s3317_s1  ;;  %p3322_p11 = scmp.lt.s32.totalorder %s2433_s24, %s2433_s24 }
  0x5a   :  { %1693 = vmatpush1.bf16.msra.mxu0 %v2887_v34  ;;  %1865 = vmatpush1.bf16.msra.mxu1 %v2888_v35  ;;  %v2445_v34 = vcombine.high %v3433_v30, %v3435_v31  ;;  %v2975_v35 = vld [vmem:[#allocation6 + $0x2e4] ss:$16 sps:$4 sm:$0xff]   ;;  %v2988_v46 = vld [vmem:[#allocation6 + $0x328] ss:$16 sps:$4 sm:$0xff]   ;;  %p3323_p12 = scmp.lt.s32.totalorder %s3321_s25, %s3317_s1 }
  0x5b   :  { %1694 = vmatprep.subr.bf16.mxu0 %v2889_v36  ;;  %1866 = vmatprep.subr.bf16.mxu1 %v2891_v37  ;;  %v2978_v36 = vld [vmem:[#allocation6 + $0x2ec] ss:$16 sps:$4 sm:$0xff]   ;;  %v2973_v37 = vld [vmem:[#allocation6 + $0x2e0] ss:$16 sps:$4 sm:$0xff]   ;;  %v2994_v50 = vld [vmem:[#allocation6 + $0x348] ss:$16 sps:$4 sm:$0xff]  }
  0x5c   :  { %p3324_p13 = por %p3323_p12, %p3322_p11 }
  0x5e   :  { %1695 = vmatpush1.bf16.msra.mxu0 %v2893_v38  ;;  %1867 = vmatpush1.bf16.msra.mxu1 %v2894_v39  ;;  %v2976_v38 = vld [vmem:[#allocation6 + $0x2e8] ss:$16 sps:$4 sm:$0xff]   ;;  %v2981_v39 = vld [vmem:[#allocation6 + $0x304] ss:$16 sps:$4 sm:$0xff]   ;;  %p3325_p0 = pnand %p3324_p13, %p3318_p10 }
  0x5f   :  { %1696 = vmatprep.subr.bf16.mxu0 %v2895_v40  ;;  %1868 = vmatprep.subr.bf16.mxu1 %v2897_v41  ;;  %v2984_v40 = vld [vmem:[#allocation6 + $0x30c] ss:$16 sps:$4 sm:$0xff]   ;;  %v2979_v41 = vld [vmem:[#allocation6 + $0x300] ss:$16 sps:$4 sm:$0xff]  }
  0x62   :  { %1697 = vmatpush1.bf16.msra.mxu0 %v2899_v42  ;;  %1869 = vmatpush1.bf16.msra.mxu1 %v2900_v43  ;;  %v2982_v42 = vld [vmem:[#allocation6 + $0x308] ss:$16 sps:$4 sm:$0xff]   ;;  %v2987_v43 = vld [vmem:[#allocation6 + $0x324] ss:$16 sps:$4 sm:$0xff]  }
  0x63   :  { %1698 = vmatprep.subr.bf16.mxu0 %v2901_v44  ;;  %1870 = vmatprep.subr.bf16.mxu1 %v2903_v45  ;;  %v2990_v44 = vld [vmem:[#allocation6 + $0x32c] ss:$16 sps:$4 sm:$0xff]   ;;  %v2985_v45 = vld [vmem:[#allocation6 + $0x320] ss:$16 sps:$4 sm:$0xff]  }
  0x66   :  { %1699 = vmatpush1.bf16.msra.mxu0 %v2905_v48  ;;  %1871 = vmatpush1.bf16.msra.mxu1 %v2906_v49  ;;  %v2996_v48 = vld [vmem:[#allocation6 + $0x34c] ss:$16 sps:$4 sm:$0xff]   ;;  %v2991_v49 = vld [vmem:[#allocation6 + $0x340] ss:$16 sps:$4 sm:$0xff]  }
  0x67   :  { %1700 = vmatprep.subr.bf16.mxu0 %v2907_v51  ;;  %1872 = vmatprep.subr.bf16.mxu1 %v2909_v52  ;;  %v2999_v51 = vld [vmem:[#allocation6 + $0x364] ss:$16 sps:$4 sm:$0xff]   ;;  %v3002_v52 = vld [vmem:[#allocation6 + $0x36c] ss:$16 sps:$4 sm:$0xff]  }
  0x6a   :  { %1701 = vmatpush1.bf16.msra.mxu0 %v2911_v53  ;;  %1873 = vmatpush1.bf16.msra.mxu1 %v2912_v54  ;;  %v2997_v53 = vld [vmem:[#allocation6 + $0x360] ss:$16 sps:$4 sm:$0xff]   ;;  %v3000_v54 = vld [vmem:[#allocation6 + $0x368] ss:$16 sps:$4 sm:$0xff]  }
  0x6b   :  { %1702 = vmatprep.subr.bf16.mxu0 %v2913_v55  ;;  %1874 = vmatprep.subr.bf16.mxu1 %v2915_v56  ;;  %v3005_v55 = vld [vmem:[#allocation6 + $0x384] ss:$16 sps:$4 sm:$0xff]   ;;  %v3008_v56 = vld [vmem:[#allocation6 + $0x38c] ss:$16 sps:$4 sm:$0xff]  }
  0x6e   :  { %1703 = vmatpush1.bf16.msra.mxu0 %v2917_v57  ;;  %1875 = vmatpush1.bf16.msra.mxu1 %v2918_v58  ;;  %v3003_v57 = vld [vmem:[#allocation6 + $0x380] ss:$16 sps:$4 sm:$0xff]   ;;  %v3006_v58 = vld [vmem:[#allocation6 + $0x388] ss:$16 sps:$4 sm:$0xff]  }
  0x6f   :  { %1704 = vmatprep.subr.bf16.mxu0 %v2919_v59  ;;  %1876 = vmatprep.subr.bf16.mxu1 %v2921_v60  ;;  %v3011_v59 = vld [vmem:[#allocation6 + $0x3a4] ss:$16 sps:$4 sm:$0xff]   ;;  %v3014_v60 = vld [vmem:[#allocation6 + $0x3ac] ss:$16 sps:$4 sm:$0xff]  }
  0x72   :  { %1705 = vmatpush1.bf16.msra.mxu0 %v2923_v61  ;;  %1877 = vmatpush1.bf16.msra.mxu1 %v2924_v62  ;;  %v3009_v61 = vld [vmem:[#allocation6 + $0x3a0] ss:$16 sps:$4 sm:$0xff]   ;;  %v3012_v62 = vld [vmem:[#allocation6 + $0x3a8] ss:$16 sps:$4 sm:$0xff]  }
  0x73   :  { %1706 = vmatprep.subr.bf16.mxu0 %v2925_v63  ;;  %1878 = vmatprep.subr.bf16.mxu1 %v2927_v0  ;;  %v3017_v63 = vld [vmem:[#allocation6 + $0x3c4] ss:$16 sps:$4 sm:$0xff]   ;;  %v3020_v0 = vld [vmem:[#allocation6 + $0x3cc] ss:$16 sps:$4 sm:$0xff]  }
  0x76   :  { %1707 = vmatpush1.bf16.msra.mxu0 %v2929_v1  ;;  %1879 = vmatpush1.bf16.msra.mxu1 %v2930_v2  ;;  %v3015_v1 = vld [vmem:[#allocation6 + $0x3c0] ss:$16 sps:$4 sm:$0xff]   ;;  %v3018_v2 = vld [vmem:[#allocation6 + $0x3c8] ss:$16 sps:$4 sm:$0xff]  }
  0x77   :  { %1719 = vmatprep.subr.bf16.mxu0 %v2933_v3  ;;  %1891 = vmatprep.subr.bf16.mxu1 %v2936_v4  ;;  %v3023_v3 = vld [vmem:[#allocation6 + $0x3e4] ss:$16 sps:$4 sm:$0xff]   ;;  %v3026_v4 = vld [vmem:[#allocation6 + $0x3ec] ss:$16 sps:$4 sm:$0xff]  }
  0x79   :  { %1709 = vmatmul.mubr.bf16.vlgmr.msra.gmra.mrb[0].mxu0 %v2442_v5  ;;  %1881 = vmatmul.mubr.bf16.vlgmr.msra.gmra.mrb[0].mxu1 %v2442_v5  ;;  %v3021_v5 = vld [vmem:[#allocation6 + $0x3e0] ss:$16 sps:$4 sm:$0xff]  }
  0x7a   :  { %1720 = vmatpush1.bf16.msra.mxu0 %v2931_v6  ;;  %1892 = vmatpush1.bf16.msra.mxu1 %v2934_v7  ;;  %v3024_v6 = vld [vmem:[#allocation6 + $0x3e8] ss:$16 sps:$4 sm:$0xff]   ;;  %v3029_v7 = vld [vmem:[#allocation6 + $0x404] ss:$16 sps:$4 sm:$0xff]  }
  0x7b   :  { %1721 = vmatprep.subr.bf16.mxu0 %v2939_v8  ;;  %1893 = vmatprep.subr.bf16.mxu1 %v2942_v9  ;;  %v3032_v8 = vld [vmem:[#allocation6 + $0x40c] ss:$16 sps:$4 sm:$0xff]   ;;  %v2444_v9 = vcombine.low %v3433_v30, %v3435_v31  ;;  %v3054_v30 = vld [vmem:[#allocation6 + $0x488] ss:$16 sps:$4 sm:$0xff]   ;;  %v3059_v31 = vld [vmem:[#allocation6 + $0x4a4] ss:$16 sps:$4 sm:$0xff]  }
  0x7c   :  { %1751 = vmatprep.mubr.bf16.mxu0 %v2445_v34  ;;  %1923 = vmatprep.mubr.bf16.mxu1 %v2445_v34  ;;  %v3060_v34 = vld [vmem:[#allocation6 + $0x4a8] ss:$16 sps:$4 sm:$0xff]  }
  0x7e   :  { %1722 = vmatpush1.bf16.msra.mxu0 %v2937_v10  ;;  %1894 = vmatpush1.bf16.msra.mxu1 %v2940_v11  ;;  %v3027_v10 = vld [vmem:[#allocation6 + $0x400] ss:$16 sps:$4 sm:$0xff]   ;;  %v3030_v11 = vld [vmem:[#allocation6 + $0x408] ss:$16 sps:$4 sm:$0xff]  }
  0x7f   :  { %1723 = vmatprep.subr.bf16.mxu0 %v2945_v12  ;;  %1895 = vmatprep.subr.bf16.mxu1 %v2948_v13  ;;  %v3035_v12 = vld [vmem:[#allocation6 + $0x424] ss:$16 sps:$4 sm:$0xff]   ;;  %v3038_v13 = vld [vmem:[#allocation6 + $0x42c] ss:$16 sps:$4 sm:$0xff]  }
  0x82   :  { %1724 = vmatpush1.bf16.msra.mxu0 %v2943_v14  ;;  %1896 = vmatpush1.bf16.msra.mxu1 %v2946_v15  ;;  %v3441_v14 = vld [vmem:[#allocation3 + $0x10] sm:$0xff] }
  0x83   :  { %1725 = vmatprep.subr.bf16.mxu0 %v2951_v16  ;;  %1897 = vmatprep.subr.bf16.mxu1 %v2954_v17  ;;  %v3443_v15 = vld [vmem:[#allocation3 + $0x30] sm:$0xff] }
  0x84   :  { %v2447_v16 = vcombine.high %v3441_v14, %v3443_v15  ;;  %v3033_v17 = vld [vmem:[#allocation6 + $0x420] ss:$16 sps:$4 sm:$0xff]  }
  0x86   :  { %1726 = vmatpush1.bf16.msra.mxu0 %v2949_v18  ;;  %1898 = vmatpush1.bf16.msra.mxu1 %v2952_v19  ;;  %v3036_v18 = vld [vmem:[#allocation6 + $0x428] ss:$16 sps:$4 sm:$0xff]   ;;  %v3041_v19 = vld [vmem:[#allocation6 + $0x444] ss:$16 sps:$4 sm:$0xff]  }
  0x87   :  { %1727 = vmatprep.subr.bf16.mxu0 %v2957_v20  ;;  %1899 = vmatprep.subr.bf16.mxu1 %v2960_v21  ;;  %v3044_v20 = vld [vmem:[#allocation6 + $0x44c] ss:$16 sps:$4 sm:$0xff]   ;;  %v3039_v21 = vld [vmem:[#allocation6 + $0x440] ss:$16 sps:$4 sm:$0xff]  }
  0x8a   :  { %1728 = vmatpush1.bf16.msra.mxu0 %v2955_v22  ;;  %1900 = vmatpush1.bf16.msra.mxu1 %v2958_v23  ;;  %v3042_v22 = vld [vmem:[#allocation6 + $0x448] ss:$16 sps:$4 sm:$0xff]   ;;  %v3047_v23 = vld [vmem:[#allocation6 + $0x464] ss:$16 sps:$4 sm:$0xff]  }
  0x8b   :  { %1729 = vmatprep.subr.bf16.mxu0 %v2963_v24  ;;  %1901 = vmatprep.subr.bf16.mxu1 %v2966_v25  ;;  %v3050_v24 = vld [vmem:[#allocation6 + $0x46c] ss:$16 sps:$4 sm:$0xff]   ;;  %v3045_v25 = vld [vmem:[#allocation6 + $0x460] ss:$16 sps:$4 sm:$0xff]  }
  0x8e   :  { %1730 = vmatpush1.bf16.msra.mxu0 %v2961_v26  ;;  %1902 = vmatpush1.bf16.msra.mxu1 %v2964_v27  ;;  %v3048_v26 = vld [vmem:[#allocation6 + $0x468] ss:$16 sps:$4 sm:$0xff]   ;;  %v3053_v27 = vld [vmem:[#allocation6 + $0x484] ss:$16 sps:$4 sm:$0xff]  }
  0x8f   :  { %1731 = vmatprep.subr.bf16.mxu0 %v2969_v28  ;;  %1903 = vmatprep.subr.bf16.mxu1 %v2972_v29  ;;  %v3056_v28 = vld [vmem:[#allocation6 + $0x48c] ss:$16 sps:$4 sm:$0xff]   ;;  %v3051_v29 = vld [vmem:[#allocation6 + $0x480] ss:$16 sps:$4 sm:$0xff]  }
  0x92   :  { %1732 = vmatpush1.bf16.msra.mxu0 %v2967_v32  ;;  %1904 = vmatpush1.bf16.msra.mxu1 %v2970_v33  ;;  %v3062_v32 = vld [vmem:[#allocation6 + $0x4ac] ss:$16 sps:$4 sm:$0xff]   ;;  %v3057_v33 = vld [vmem:[#allocation6 + $0x4a0] ss:$16 sps:$4 sm:$0xff]  }
  0x93   :  { %1733 = vmatprep.subr.bf16.mxu0 %v2975_v35  ;;  %1905 = vmatprep.subr.bf16.mxu1 %v2978_v36  ;;  %v3065_v35 = vld [vmem:[#allocation6 + $0x4c4] ss:$16 sps:$4 sm:$0xff]   ;;  %v3068_v36 = vld [vmem:[#allocation6 + $0x4cc] ss:$16 sps:$4 sm:$0xff]  }
  0x96   :  { %1734 = vmatpush1.bf16.msra.mxu0 %v2973_v37  ;;  %1906 = vmatpush1.bf16.msra.mxu1 %v2976_v38  ;;  %v3063_v37 = vld [vmem:[#allocation6 + $0x4c0] ss:$16 sps:$4 sm:$0xff]   ;;  %v3066_v38 = vld [vmem:[#allocation6 + $0x4c8] ss:$16 sps:$4 sm:$0xff]  }
  0x97   :  { %1735 = vmatprep.subr.bf16.mxu0 %v2981_v39  ;;  %1907 = vmatprep.subr.bf16.mxu1 %v2984_v40  ;;  %v3071_v39 = vld [vmem:[#allocation6 + $0x4e4] ss:$16 sps:$4 sm:$0xff]   ;;  %v3074_v40 = vld [vmem:[#allocation6 + $0x4ec] ss:$16 sps:$4 sm:$0xff]  }
  0x9a   :  { %1736 = vmatpush1.bf16.msra.mxu0 %v2979_v41  ;;  %1908 = vmatpush1.bf16.msra.mxu1 %v2982_v42  ;;  %v3069_v41 = vld [vmem:[#allocation6 + $0x4e0] ss:$16 sps:$4 sm:$0xff]   ;;  %v3072_v42 = vld [vmem:[#allocation6 + $0x4e8] ss:$16 sps:$4 sm:$0xff]  }
  0x9b   :  { %1737 = vmatprep.subr.bf16.mxu0 %v2987_v43  ;;  %1909 = vmatprep.subr.bf16.mxu1 %v2990_v44  ;;  %v3077_v43 = vld [vmem:[#allocation6 + $0x504] ss:$16 sps:$4 sm:$0xff]   ;;  %v3080_v44 = vld [vmem:[#allocation6 + $0x50c] ss:$16 sps:$4 sm:$0xff]  }
  0x9e   :  { %1738 = vmatpush1.bf16.msra.mxu0 %v2985_v45  ;;  %1910 = vmatpush1.bf16.msra.mxu1 %v2988_v46  ;;  %v3075_v45 = vld [vmem:[#allocation6 + $0x500] ss:$16 sps:$4 sm:$0xff]   ;;  %v3078_v46 = vld [vmem:[#allocation6 + $0x508] ss:$16 sps:$4 sm:$0xff]  }
  0x9f   :  { %1739 = vmatprep.subr.bf16.mxu0 %v2993_v47  ;;  %1911 = vmatprep.subr.bf16.mxu1 %v2996_v48  ;;  %v3083_v47 = vld [vmem:[#allocation6 + $0x524] ss:$16 sps:$4 sm:$0xff]   ;;  %v3086_v48 = vld [vmem:[#allocation6 + $0x52c] ss:$16 sps:$4 sm:$0xff]  }
  0xa2   :  { %1740 = vmatpush1.bf16.msra.mxu0 %v2991_v49  ;;  %1912 = vmatpush1.bf16.msra.mxu1 %v2994_v50  ;;  %v3081_v49 = vld [vmem:[#allocation6 + $0x520] ss:$16 sps:$4 sm:$0xff]   ;;  %v3084_v50 = vld [vmem:[#allocation6 + $0x528] ss:$16 sps:$4 sm:$0xff]  }
  0xa3   :  { %1741 = vmatprep.subr.bf16.mxu0 %v2999_v51  ;;  %1913 = vmatprep.subr.bf16.mxu1 %v3002_v52  ;;  %v3089_v51 = vld [vmem:[#allocation6 + $0x544] ss:$16 sps:$4 sm:$0xff]   ;;  %v3092_v52 = vld [vmem:[#allocation6 + $0x54c] ss:$16 sps:$4 sm:$0xff]  }
  0xa6   :  { %1742 = vmatpush1.bf16.msra.mxu0 %v2997_v53  ;;  %1914 = vmatpush1.bf16.msra.mxu1 %v3000_v54  ;;  %v3087_v53 = vld [vmem:[#allocation6 + $0x540] ss:$16 sps:$4 sm:$0xff]   ;;  %v3090_v54 = vld [vmem:[#allocation6 + $0x548] ss:$16 sps:$4 sm:$0xff]  }
  0xa7   :  { %1743 = vmatprep.subr.bf16.mxu0 %v3005_v55  ;;  %1915 = vmatprep.subr.bf16.mxu1 %v3008_v56  ;;  %v3095_v55 = vld [vmem:[#allocation6 + $0x564] ss:$16 sps:$4 sm:$0xff]   ;;  %v3098_v56 = vld [vmem:[#allocation6 + $0x56c] ss:$16 sps:$4 sm:$0xff]  }
  0xaa   :  { %1744 = vmatpush1.bf16.msra.mxu0 %v3003_v57  ;;  %1916 = vmatpush1.bf16.msra.mxu1 %v3006_v58  ;;  %v3093_v57 = vld [vmem:[#allocation6 + $0x560] ss:$16 sps:$4 sm:$0xff]   ;;  %v3096_v58 = vld [vmem:[#allocation6 + $0x568] ss:$16 sps:$4 sm:$0xff]  }
  0xab   :  { %1745 = vmatprep.subr.bf16.mxu0 %v3011_v59  ;;  %1917 = vmatprep.subr.bf16.mxu1 %v3014_v60  ;;  %v3101_v59 = vld [vmem:[#allocation6 + $0x584] ss:$16 sps:$4 sm:$0xff]   ;;  %v3104_v60 = vld [vmem:[#allocation6 + $0x58c] ss:$16 sps:$4 sm:$0xff]  }
  0xae   :  { %1746 = vmatpush1.bf16.msra.mxu0 %v3009_v61  ;;  %1918 = vmatpush1.bf16.msra.mxu1 %v3012_v62  ;;  %v3099_v61 = vld [vmem:[#allocation6 + $0x580] ss:$16 sps:$4 sm:$0xff]   ;;  %v3102_v62 = vld [vmem:[#allocation6 + $0x588] ss:$16 sps:$4 sm:$0xff]  }
  0xaf   :  { %1747 = vmatprep.subr.bf16.mxu0 %v3017_v63  ;;  %1919 = vmatprep.subr.bf16.mxu1 %v3020_v0  ;;  %v3107_v63 = vld [vmem:[#allocation6 + $0x5a4] ss:$16 sps:$4 sm:$0xff]   ;;  %v3110_v0 = vld [vmem:[#allocation6 + $0x5ac] ss:$16 sps:$4 sm:$0xff]  }
  0xb2   :  { %1748 = vmatpush1.bf16.msra.mxu0 %v3015_v1  ;;  %1920 = vmatpush1.bf16.msra.mxu1 %v3018_v2  ;;  %v3105_v1 = vld [vmem:[#allocation6 + $0x5a0] ss:$16 sps:$4 sm:$0xff]   ;;  %v3108_v2 = vld [vmem:[#allocation6 + $0x5a8] ss:$16 sps:$4 sm:$0xff]  }
  0xb3   :  { %1749 = vmatprep.subr.bf16.mxu0 %v3023_v3  ;;  %1921 = vmatprep.subr.bf16.mxu1 %v3026_v4  ;;  %v3113_v3 = vld [vmem:[#allocation6 + $0x5c4] ss:$16 sps:$4 sm:$0xff]   ;;  %v3116_v4 = vld [vmem:[#allocation6 + $0x5cc] ss:$16 sps:$4 sm:$0xff]  }
  0xb6   :  { %1750 = vmatpush1.bf16.msra.mxu0 %v3021_v5  ;;  %1922 = vmatpush1.bf16.msra.mxu1 %v3024_v6  ;;  %v3111_v5 = vld [vmem:[#allocation6 + $0x5c0] ss:$16 sps:$4 sm:$0xff]   ;;  %v3114_v6 = vld [vmem:[#allocation6 + $0x5c8] ss:$16 sps:$4 sm:$0xff]  }
  0xb7   :  { %1762 = vmatprep.subr.bf16.mxu0 %v3029_v7  ;;  %1934 = vmatprep.subr.bf16.mxu1 %v3032_v8  ;;  %v3119_v7 = vld [vmem:[#allocation6 + $0x5e4] ss:$16 sps:$4 sm:$0xff]   ;;  %v3122_v8 = vld [vmem:[#allocation6 + $0x5ec] ss:$16 sps:$4 sm:$0xff]  }
  0xb9   :  { %1752 = vmatmul.mubr.bf16.vlgmr.msra.gmra.mrb[0].mxu0 %v2444_v9  ;;  %1924 = vmatmul.mubr.bf16.vlgmr.msra.gmra.mrb[0].mxu1 %v2444_v9  ;;  %v3117_v9 = vld [vmem:[#allocation6 + $0x5e0] ss:$16 sps:$4 sm:$0xff]  }
  0xba   :  { %1763 = vmatpush1.bf16.msra.mxu0 %v3027_v10  ;;  %1935 = vmatpush1.bf16.msra.mxu1 %v3030_v11  ;;  %v3120_v10 = vld [vmem:[#allocation6 + $0x5e8] ss:$16 sps:$4 sm:$0xff]   ;;  %v3125_v11 = vld [vmem:[#allocation6 + $0x604] ss:$16 sps:$4 sm:$0xff]  }
  0xbb   :  { %1764 = vmatprep.subr.bf16.mxu0 %v3035_v12  ;;  %1936 = vmatprep.subr.bf16.mxu1 %v3038_v13  ;;  %v3128_v12 = vld [vmem:[#allocation6 + $0x60c] ss:$16 sps:$4 sm:$0xff]   ;;  %v3123_v13 = vld [vmem:[#allocation6 + $0x600] ss:$16 sps:$4 sm:$0xff]  }
  0xbc   :  { %1794 = vmatprep.mubr.bf16.mxu0 %v2447_v16  ;;  %1966 = vmatprep.mubr.bf16.mxu1 %v2447_v16  ;;  %v3126_v16 = vld [vmem:[#allocation6 + $0x608] ss:$16 sps:$4 sm:$0xff]  }
  0xbe   :  { %1765 = vmatpush1.bf16.msra.mxu0 %v3033_v17  ;;  %1937 = vmatpush1.bf16.msra.mxu1 %v3036_v18  ;;  %v3447_v17 = vld [vmem:[#allocation3 + $0x18] sm:$0xff]  ;;  %v2446_v18 = vcombine.low %v3441_v14, %v3443_v15  ;;  %v3135_v14 = vld [vmem:[#allocation6 + $0x640] ss:$16 sps:$4 sm:$0xff]  }
  0xbf   :  { %1766 = vmatprep.subr.bf16.mxu0 %v3041_v19  ;;  %1938 = vmatprep.subr.bf16.mxu1 %v3044_v20  ;;  %v3451_v19 = vld [vmem:[#allocation3 + $0x38] sm:$0xff]  ;;  %v3131_v20 = vld [vmem:[#allocation6 + $0x624] ss:$16 sps:$4 sm:$0xff]  }
  0xc0   :  { %v3138_v15 = vld [vmem:[#allocation6 + $0x648] ss:$16 sps:$4 sm:$0xff]  }
  0xc2   :  { %1767 = vmatpush1.bf16.msra.mxu0 %v3039_v21  ;;  %1939 = vmatpush1.bf16.msra.mxu1 %v3042_v22  ;;  %v3134_v21 = vld [vmem:[#allocation6 + $0x62c] ss:$16 sps:$4 sm:$0xff]   ;;  %v3129_v22 = vld [vmem:[#allocation6 + $0x620] ss:$16 sps:$4 sm:$0xff]  }
  0xc3   :  { %1768 = vmatprep.subr.bf16.mxu0 %v3047_v23  ;;  %1940 = vmatprep.subr.bf16.mxu1 %v3050_v24  ;;  %v3132_v23 = vld [vmem:[#allocation6 + $0x628] ss:$16 sps:$4 sm:$0xff]   ;;  %v2449_v24 = vcombine.high %v3447_v17, %v3451_v19 }
  0xc6   :  { %1769 = vmatpush1.bf16.msra.mxu0 %v3045_v25  ;;  %1941 = vmatpush1.bf16.msra.mxu1 %v3048_v26  ;;  %v3137_v25 = vld [vmem:[#allocation6 + $0x644] ss:$16 sps:$4 sm:$0xff]   ;;  %v3140_v26 = vld [vmem:[#allocation6 + $0x64c] ss:$16 sps:$4 sm:$0xff]  }
  0xc7   :  { %1770 = vmatprep.subr.bf16.mxu0 %v3053_v27  ;;  %1942 = vmatprep.subr.bf16.mxu1 %v3056_v28  ;;  %v3143_v27 = vld [vmem:[#allocation6 + $0x664] ss:$16 sps:$4 sm:$0xff]   ;;  %v3146_v28 = vld [vmem:[#allocation6 + $0x66c] ss:$16 sps:$4 sm:$0xff]  }
  0xca   :  { %1771 = vmatpush1.bf16.msra.mxu0 %v3051_v29  ;;  %1943 = vmatpush1.bf16.msra.mxu1 %v3054_v30  ;;  %v3141_v29 = vld [vmem:[#allocation6 + $0x660] ss:$16 sps:$4 sm:$0xff]   ;;  %v3144_v30 = vld [vmem:[#allocation6 + $0x668] ss:$16 sps:$4 sm:$0xff]  }
  0xcb   :  { %1772 = vmatprep.subr.bf16.mxu0 %v3059_v31  ;;  %1944 = vmatprep.subr.bf16.mxu1 %v3062_v32  ;;  %v3149_v31 = vld [vmem:[#allocation6 + $0x684] ss:$16 sps:$4 sm:$0xff]   ;;  %v3152_v32 = vld [vmem:[#allocation6 + $0x68c] ss:$16 sps:$4 sm:$0xff]  }
  0xce   :  { %1773 = vmatpush1.bf16.msra.mxu0 %v3057_v33  ;;  %1945 = vmatpush1.bf16.msra.mxu1 %v3060_v34  ;;  %v3147_v33 = vld [vmem:[#allocation6 + $0x680] ss:$16 sps:$4 sm:$0xff]   ;;  %v3150_v34 = vld [vmem:[#allocation6 + $0x688] ss:$16 sps:$4 sm:$0xff]  }
  0xcf   :  { %1774 = vmatprep.subr.bf16.mxu0 %v3065_v35  ;;  %1946 = vmatprep.subr.bf16.mxu1 %v3068_v36  ;;  %v3155_v35 = vld [vmem:[#allocation6 + $0x6a4] ss:$16 sps:$4 sm:$0xff]   ;;  %v3158_v36 = vld [vmem:[#allocation6 + $0x6ac] ss:$16 sps:$4 sm:$0xff]  }
  0xd2   :  { %1775 = vmatpush1.bf16.msra.mxu0 %v3063_v37  ;;  %1947 = vmatpush1.bf16.msra.mxu1 %v3066_v38  ;;  %v3153_v37 = vld [vmem:[#allocation6 + $0x6a0] ss:$16 sps:$4 sm:$0xff]   ;;  %v3156_v38 = vld [vmem:[#allocation6 + $0x6a8] ss:$16 sps:$4 sm:$0xff]  }
  0xd3   :  { %1776 = vmatprep.subr.bf16.mxu0 %v3071_v39  ;;  %1948 = vmatprep.subr.bf16.mxu1 %v3074_v40  ;;  %v3161_v39 = vld [vmem:[#allocation6 + $0x6c4] ss:$16 sps:$4 sm:$0xff]   ;;  %v3164_v40 = vld [vmem:[#allocation6 + $0x6cc] ss:$16 sps:$4 sm:$0xff]  }
  0xd6   :  { %1777 = vmatpush1.bf16.msra.mxu0 %v3069_v41  ;;  %1949 = vmatpush1.bf16.msra.mxu1 %v3072_v42  ;;  %v3159_v41 = vld [vmem:[#allocation6 + $0x6c0] ss:$16 sps:$4 sm:$0xff]   ;;  %v3162_v42 = vld [vmem:[#allocation6 + $0x6c8] ss:$16 sps:$4 sm:$0xff]  }
  0xd7   :  { %1778 = vmatprep.subr.bf16.mxu0 %v3077_v43  ;;  %1950 = vmatprep.subr.bf16.mxu1 %v3080_v44  ;;  %v3167_v43 = vld [vmem:[#allocation6 + $0x6e4] ss:$16 sps:$4 sm:$0xff]   ;;  %v3170_v44 = vld [vmem:[#allocation6 + $0x6ec] ss:$16 sps:$4 sm:$0xff]  }
  0xda   :  { %1779 = vmatpush1.bf16.msra.mxu0 %v3075_v45  ;;  %1951 = vmatpush1.bf16.msra.mxu1 %v3078_v46  ;;  %v3165_v45 = vld [vmem:[#allocation6 + $0x6e0] ss:$16 sps:$4 sm:$0xff]   ;;  %v3168_v46 = vld [vmem:[#allocation6 + $0x6e8] ss:$16 sps:$4 sm:$0xff]  }
  0xdb   :  { %1780 = vmatprep.subr.bf16.mxu0 %v3083_v47  ;;  %1952 = vmatprep.subr.bf16.mxu1 %v3086_v48  ;;  %v3173_v47 = vld [vmem:[#allocation6 + $0x704] ss:$16 sps:$4 sm:$0xff]   ;;  %v3176_v48 = vld [vmem:[#allocation6 + $0x70c] ss:$16 sps:$4 sm:$0xff]  }
  0xde   :  { %1781 = vmatpush1.bf16.msra.mxu0 %v3081_v49  ;;  %1953 = vmatpush1.bf16.msra.mxu1 %v3084_v50  ;;  %v3171_v49 = vld [vmem:[#allocation6 + $0x700] ss:$16 sps:$4 sm:$0xff]   ;;  %v3174_v50 = vld [vmem:[#allocation6 + $0x708] ss:$16 sps:$4 sm:$0xff]  }
  0xdf   :  { %1782 = vmatprep.subr.bf16.mxu0 %v3089_v51  ;;  %1954 = vmatprep.subr.bf16.mxu1 %v3092_v52  ;;  %v3179_v51 = vld [vmem:[#allocation6 + $0x724] ss:$16 sps:$4 sm:$0xff]   ;;  %v3182_v52 = vld [vmem:[#allocation6 + $0x72c] ss:$16 sps:$4 sm:$0xff]  }
  0xe2   :  { %1783 = vmatpush1.bf16.msra.mxu0 %v3087_v53  ;;  %1955 = vmatpush1.bf16.msra.mxu1 %v3090_v54  ;;  %v3177_v53 = vld [vmem:[#allocation6 + $0x720] ss:$16 sps:$4 sm:$0xff]   ;;  %v3180_v54 = vld [vmem:[#allocation6 + $0x728] ss:$16 sps:$4 sm:$0xff]  }
  0xe3   :  { %1784 = vmatprep.subr.bf16.mxu0 %v3095_v55  ;;  %1956 = vmatprep.subr.bf16.mxu1 %v3098_v56  ;;  %v3185_v55 = vld [vmem:[#allocation6 + $0x744] ss:$16 sps:$4 sm:$0xff]   ;;  %v3188_v56 = vld [vmem:[#allocation6 + $0x74c] ss:$16 sps:$4 sm:$0xff]  }
  0xe6   :  { %1785 = vmatpush1.bf16.msra.mxu0 %v3093_v57  ;;  %1957 = vmatpush1.bf16.msra.mxu1 %v3096_v58  ;;  %v3183_v57 = vld [vmem:[#allocation6 + $0x740] ss:$16 sps:$4 sm:$0xff]   ;;  %v3186_v58 = vld [vmem:[#allocation6 + $0x748] ss:$16 sps:$4 sm:$0xff]  }
  0xe7   :  { %1786 = vmatprep.subr.bf16.mxu0 %v3101_v59  ;;  %1958 = vmatprep.subr.bf16.mxu1 %v3104_v60  ;;  %v3191_v59 = vld [vmem:[#allocation6 + $0x764] ss:$16 sps:$4 sm:$0xff]   ;;  %v3194_v60 = vld [vmem:[#allocation6 + $0x76c] ss:$16 sps:$4 sm:$0xff]  }
  0xea   :  { %1787 = vmatpush1.bf16.msra.mxu0 %v3099_v61  ;;  %1959 = vmatpush1.bf16.msra.mxu1 %v3102_v62  ;;  %v3189_v61 = vld [vmem:[#allocation6 + $0x760] ss:$16 sps:$4 sm:$0xff]   ;;  %v3192_v62 = vld [vmem:[#allocation6 + $0x768] ss:$16 sps:$4 sm:$0xff]  }
  0xeb   :  { %1788 = vmatprep.subr.bf16.mxu0 %v3107_v63  ;;  %1960 = vmatprep.subr.bf16.mxu1 %v3110_v0  ;;  %v3197_v63 = vld [vmem:[#allocation6 + $0x784] ss:$16 sps:$4 sm:$0xff]   ;;  %v3200_v0 = vld [vmem:[#allocation6 + $0x78c] ss:$16 sps:$4 sm:$0xff]  }
  0xee   :  { %1789 = vmatpush1.bf16.msra.mxu0 %v3105_v1  ;;  %1961 = vmatpush1.bf16.msra.mxu1 %v3108_v2  ;;  %v3195_v1 = vld [vmem:[#allocation6 + $0x780] ss:$16 sps:$4 sm:$0xff]   ;;  %v3198_v2 = vld [vmem:[#allocation6 + $0x788] ss:$16 sps:$4 sm:$0xff]  }
  0xef   :  { %1790 = vmatprep.subr.bf16.mxu0 %v3113_v3  ;;  %1962 = vmatprep.subr.bf16.mxu1 %v3116_v4  ;;  %v3203_v3 = vld [vmem:[#allocation6 + $0x7a4] ss:$16 sps:$4 sm:$0xff]   ;;  %v3206_v4 = vld [vmem:[#allocation6 + $0x7ac] ss:$16 sps:$4 sm:$0xff]  }
  0xf2   :  { %1791 = vmatpush1.bf16.msra.mxu0 %v3111_v5  ;;  %1963 = vmatpush1.bf16.msra.mxu1 %v3114_v6  ;;  %v3201_v5 = vld [vmem:[#allocation6 + $0x7a0] ss:$16 sps:$4 sm:$0xff]   ;;  %v3204_v6 = vld [vmem:[#allocation6 + $0x7a8] ss:$16 sps:$4 sm:$0xff]  }
  0xf3   :  { %1792 = vmatprep.subr.bf16.mxu0 %v3119_v7  ;;  %1964 = vmatprep.subr.bf16.mxu1 %v3122_v8  ;;  %v3209_v7 = vld [vmem:[#allocation6 + $0x7c4] ss:$16 sps:$4 sm:$0xff]   ;;  %v3212_v8 = vld [vmem:[#allocation6 + $0x7cc] ss:$16 sps:$4 sm:$0xff]  }
  0xf6   :  { %1793 = vmatpush1.bf16.msra.mxu0 %v3117_v9  ;;  %1965 = vmatpush1.bf16.msra.mxu1 %v3120_v10  ;;  %v3207_v9 = vld [vmem:[#allocation6 + $0x7c0] ss:$16 sps:$4 sm:$0xff]   ;;  %v3210_v10 = vld [vmem:[#allocation6 + $0x7c8] ss:$16 sps:$4 sm:$0xff]  }
  0xf7   :  { %1805 = vmatprep.subr.bf16.mxu0 %v3125_v11  ;;  %1977 = vmatprep.subr.bf16.mxu1 %v3128_v12  ;;  %v3215_v11 = vld [vmem:[#allocation6 + $0x7e4] ss:$16 sps:$4 sm:$0xff]   ;;  %v3218_v12 = vld [vmem:[#allocation6 + $0x7ec] ss:$16 sps:$4 sm:$0xff]  }
  0xf9   :  { %1795 = vmatmul.mubr.bf16.vlgmr.msra.gmra.mrb[0].mxu0 %v2446_v18  ;;  %1967 = vmatmul.mubr.bf16.vlgmr.msra.gmra.mrb[0].mxu1 %v2446_v18  ;;  %v3219_v18 = vld [vmem:[#allocation8 + $0x40] sm:$0xff]  }
  0xfa   :  { %1806 = vmatpush1.bf16.msra.mxu0 %v3123_v13  ;;  %1978 = vmatpush1.bf16.msra.mxu1 %v3126_v16  ;;  %v3213_v13 = vld [vmem:[#allocation6 + $0x7e0] ss:$16 sps:$4 sm:$0xff]   ;;  %v3216_v16 = vld [vmem:[#allocation6 + $0x7e8] ss:$16 sps:$4 sm:$0xff]  }
  0xfb   :  { %1807 = vmatprep.subr.bf16.mxu0 %v3131_v20  ;;  %1979 = vmatprep.subr.bf16.mxu1 %v3134_v21  ;;  %v3220_v20 = vld [vmem:[#allocation8 + $0xc0] sm:$0xff]   ;;  %v2448_v21 = vcombine.low %v3447_v17, %v3451_v19  ;;  %v3229_v17 = vld [vmem:[#allocation8 + $0x10] sm:$0xff]  }
  0xfc   :  { %1837 = vmatprep.mubr.bf16.mxu0 %v2449_v24  ;;  %2009 = vmatprep.mubr.bf16.mxu1 %v2449_v24  ;;  %v3223_v24 = vld [vmem:[#allocation8 + $0x48] sm:$0xff]   ;;  %v3230_v19 = vld [vmem:[#allocation8 + $0x90] sm:$0xff]  }
  0xfe   :  { %1808 = vmatpush1.bf16.msra.mxu0 %v3129_v22  ;;  %1980 = vmatpush1.bf16.msra.mxu1 %v3132_v23  ;;  %v3221_v22 = vld [vmem:[#allocation8] sm:$0xff]  }
  0xff   :  { %1809 = vmatprep.subr.bf16.mxu0 %v3137_v25  ;;  %1981 = vmatprep.subr.bf16.mxu1 %v3140_v26  ;;  %v3222_v23 = vld [vmem:[#allocation8 + $0x80] sm:$0xff]   ;;  %v3224_v25 = vld [vmem:[#allocation8 + $0xc8] sm:$0xff]  }
 0x100   :  { %v3225_v26 = vld [vmem:[#allocation8 + $0x8] sm:$0xff]  }
 0x102   :  { %1810 = vmatpush1.bf16.msra.mxu0 %v3135_v14  ;;  %1982 = vmatpush1.bf16.msra.mxu1 %v3138_v15  ;;  %v3226_v14 = vld [vmem:[#allocation8 + $0x88] sm:$0xff]   ;;  %v3227_v15 = vld [vmem:[#allocation8 + $0x50] sm:$0xff]  }
 0x103   :  { %1811 = vmatprep.subr.bf16.mxu0 %v3143_v27  ;;  %1983 = vmatprep.subr.bf16.mxu1 %v3146_v28  ;;  %v3228_v27 = vld [vmem:[#allocation8 + $0xd0] sm:$0xff]   ;;  %v3231_v28 = vld [vmem:[#allocation8 + $0x58] sm:$0xff]  }
 0x106   :  { %1812 = vmatpush1.bf16.msra.mxu0 %v3141_v29  ;;  %1984 = vmatpush1.bf16.msra.mxu1 %v3144_v30  ;;  %v3232_v29 = vld [vmem:[#allocation8 + $0xd8] sm:$0xff]  }
 0x107   :  { %1813 = vmatprep.subr.bf16.mxu0 %v3149_v31  ;;  %1985 = vmatprep.subr.bf16.mxu1 %v3152_v32  ;;  %v3233_v30 = vld [vmem:[#allocation8 + $0x18] sm:$0xff]   ;;  %v3235_v32 = vld [vmem:[#allocation8 + $0x60] sm:$0xff]  }
 0x108   :  { %v3234_v31 = vld [vmem:[#allocation8 + $0x98] sm:$0xff]  }
 0x10a   :  { %1814 = vmatpush1.bf16.msra.mxu0 %v3147_v33  ;;  %1986 = vmatpush1.bf16.msra.mxu1 %v3150_v34  ;;  %v3236_v33 = vld [vmem:[#allocation8 + $0xe0] sm:$0xff]  }
 0x10b   :  { %1815 = vmatprep.subr.bf16.mxu0 %v3155_v35  ;;  %1987 = vmatprep.subr.bf16.mxu1 %v3158_v36  ;;  %v3237_v34 = vld [vmem:[#allocation8 + $0x20] sm:$0xff]   ;;  %v3239_v36 = vld [vmem:[#allocation8 + $0x68] sm:$0xff]  }
 0x10c   :  { %v3238_v35 = vld [vmem:[#allocation8 + $0xa0] sm:$0xff]  }
 0x10e   :  { %1816 = vmatpush1.bf16.msra.mxu0 %v3153_v37  ;;  %1988 = vmatpush1.bf16.msra.mxu1 %v3156_v38  ;;  %v3240_v37 = vld [vmem:[#allocation8 + $0xe8] sm:$0xff]  }
 0x10f   :  { %1817 = vmatprep.subr.bf16.mxu0 %v3161_v39  ;;  %1989 = vmatprep.subr.bf16.mxu1 %v3164_v40  ;;  %v3241_v38 = vld [vmem:[#allocation8 + $0x28] sm:$0xff]   ;;  %v3243_v40 = vld [vmem:[#allocation8 + $0x70] sm:$0xff]  }
 0x110   :  { %v3242_v39 = vld [vmem:[#allocation8 + $0xa8] sm:$0xff]  }
 0x112   :  { %1818 = vmatpush1.bf16.msra.mxu0 %v3159_v41  ;;  %1990 = vmatpush1.bf16.msra.mxu1 %v3162_v42  ;;  %v3244_v41 = vld [vmem:[#allocation8 + $0xf0] sm:$0xff]  }
 0x113   :  { %1819 = vmatprep.subr.bf16.mxu0 %v3167_v43  ;;  %1991 = vmatprep.subr.bf16.mxu1 %v3170_v44  ;;  %v3245_v42 = vld [vmem:[#allocation8 + $0x30] sm:$0xff]   ;;  %v3247_v44 = vld [vmem:[#allocation8 + $0x78] sm:$0xff]  }
 0x114   :  { %v3246_v43 = vld [vmem:[#allocation8 + $0xb0] sm:$0xff]  }
 0x116   :  { %1820 = vmatpush1.bf16.msra.mxu0 %v3165_v45  ;;  %1992 = vmatpush1.bf16.msra.mxu1 %v3168_v46  ;;  %v3248_v45 = vld [vmem:[#allocation8 + $0xf8] sm:$0xff]  }
 0x117   :  { %1821 = vmatprep.subr.bf16.mxu0 %v3173_v47  ;;  %1993 = vmatprep.subr.bf16.mxu1 %v3176_v48  ;;  %v3249_v46 = vld [vmem:[#allocation8 + $0x38] sm:$0xff]   ;;  %v336_v48 = vlaneseq }
 0x118   :  { %v3250_v47 = vld [vmem:[#allocation8 + $0xb8] sm:$0xff]  }
 0x11a   :  { %1822 = vmatpush1.bf16.msra.mxu0 %v3171_v49  ;;  %1994 = vmatpush1.bf16.msra.mxu1 %v3174_v50  ;;  %v337_v49 = vshrl.u32 %v336_v48, 7 }
 0x11b   :  { %1823 = vmatprep.subr.bf16.mxu0 %v3179_v51  ;;  %1995 = vmatprep.subr.bf16.mxu1 %v3182_v52  ;;  %v334_v52 = vld [vmem:[%s3483_s2] sm:$0xf] }
 0x11c   :  { %v338_v50 = vsub.s32 0, %v337_v49  ;;  %v346_v51 = vsub.s32 2, %v337_v49 }
 0x11e   :  { %1824 = vmatpush1.bf16.msra.mxu0 %v3177_v53  ;;  %1996 = vmatpush1.bf16.msra.mxu1 %v3180_v54  ;;  %v342_v53 = vsub.s32 1, %v337_v49  ;;  %v350_v54 = vsub.s32 3, %v337_v49 }
 0x11f   :  { %1825 = vmatprep.subr.bf16.mxu0 %v3185_v55  ;;  %1997 = vmatprep.subr.bf16.mxu1 %v3188_v56  ;;  %v339_v55 = vrot.slane %v334_v52, %v338_v50  ;;  %v347_v56 = vrot.slane %v334_v52, %v346_v51 }
 0x122   :  { %1826 = vmatpush1.bf16.msra.mxu0 %v3183_v57  ;;  %1998 = vmatpush1.bf16.msra.mxu1 %v3186_v58  ;;  %v343_v57 = vrot.slane %v334_v52, %v342_v53  ;;  %v351_v58 = vrot.slane %v334_v52, %v350_v54 }
 0x123   :  { %1827 = vmatprep.subr.bf16.mxu0 %v3191_v59  ;;  %1999 = vmatprep.subr.bf16.mxu1 %v3194_v60 }
 0x126   :  { %1828 = vmatpush1.bf16.msra.mxu0 %v3189_v61  ;;  %2000 = vmatpush1.bf16.msra.mxu1 %v3192_v62 }
 0x127   :  { %1829 = vmatprep.subr.bf16.mxu0 %v3197_v63  ;;  %2001 = vmatprep.subr.bf16.mxu1 %v3200_v0 }
 0x12a   :  { %1830 = vmatpush1.bf16.msra.mxu0 %v3195_v1  ;;  %2002 = vmatpush1.bf16.msra.mxu1 %v3198_v2 }
 0x12b   :  { %1831 = vmatprep.subr.bf16.mxu0 %v3203_v3  ;;  %2003 = vmatprep.subr.bf16.mxu1 %v3206_v4 }
 0x12e   :  { %1832 = vmatpush1.bf16.msra.mxu0 %v3201_v5  ;;  %2004 = vmatpush1.bf16.msra.mxu1 %v3204_v6 }
 0x12f   :  { %1833 = vmatprep.subr.bf16.mxu0 %v3209_v7  ;;  %2005 = vmatprep.subr.bf16.mxu1 %v3212_v8 }
 0x132   :  { %1834 = vmatpush1.bf16.msra.mxu0 %v3207_v9  ;;  %2006 = vmatpush1.bf16.msra.mxu1 %v3210_v10 }
 0x133   :  { %1835 = vmatprep.subr.bf16.mxu0 %v3215_v11  ;;  %2007 = vmatprep.subr.bf16.mxu1 %v3218_v12 }
 0x136   :  { %1836 = vmatpush1.bf16.msra.mxu0 %v3213_v13  ;;  %2008 = vmatpush1.bf16.msra.mxu1 %v3216_v16 }
 0x137   :  { %2739 = vmatprep.subr.bf16.mxu0 %v3219_v18  ;;  %2761 = vmatprep.subr.bf16.mxu1 %v3220_v20 }
 0x139   :  { %1838 = vmatmul.mubr.bf16.vlgmr.msra.gmra.mrb[0].mxu0 %v2448_v21  ;;  %2010 = vmatmul.mubr.bf16.vlgmr.msra.gmra.mrb[0].mxu1 %v2448_v21 }
 0x13a   :  { %2740 = vmatpush3.bf16.msra.mxu0 %v3221_v22  ;;  %2762 = vmatpush3.bf16.msra.mxu1 %v3222_v23 }
 0x13b   :  { %2741 = vmatprep.subr.bf16.mxu0 %v3223_v24  ;;  %2763 = vmatprep.subr.bf16.mxu1 %v3224_v25 }
 0x13e   :  { %2742 = vmatpush3.bf16.msra.mxu0 %v3225_v26  ;;  %2764 = vmatpush3.bf16.msra.mxu1 %v3226_v14  ;;  %v3354_v14 = vmov 0.0  }
 0x13f   :  { %2743 = vmatprep.subr.bf16.mxu0 %v3227_v15  ;;  %2765 = vmatprep.subr.bf16.mxu1 %v3228_v27 }
 0x142   :  { %2744 = vmatpush3.bf16.msra.mxu0 %v3229_v17  ;;  %2766 = vmatpush3.bf16.msra.mxu1 %v3230_v19  ;;  %v2706_v17 = vld [vmem:[%s3485_s4] ss:$0 sm:$0xff] }
 0x143   :  { %2745 = vmatprep.subr.bf16.mxu0 %v3231_v28  ;;  %2767 = vmatprep.subr.bf16.mxu1 %v3232_v29 }
 0x146   :  { %2746 = vmatpush3.bf16.msra.mxu0 %v3233_v30  ;;  %2768 = vmatpush3.bf16.msra.mxu1 %v3234_v31 }
 0x147   :  { %2747 = vmatprep.subr.bf16.mxu0 %v3235_v32  ;;  %2769 = vmatprep.subr.bf16.mxu1 %v3236_v33 }
 0x14a   :  { %2748 = vmatpush3.bf16.msra.mxu0 %v3237_v34  ;;  %2770 = vmatpush3.bf16.msra.mxu1 %v3238_v35 }
 0x14b   :  { %2749 = vmatprep.subr.bf16.mxu0 %v3239_v36  ;;  %2771 = vmatprep.subr.bf16.mxu1 %v3240_v37 }
 0x14e   :  { %2750 = vmatpush3.bf16.msra.mxu0 %v3241_v38  ;;  %2772 = vmatpush3.bf16.msra.mxu1 %v3242_v39 }
 0x14f   :  { %2751 = vmatprep.subr.bf16.mxu0 %v3243_v40  ;;  %2773 = vmatprep.subr.bf16.mxu1 %v3244_v41 }
 0x152   :  { %2752 = vmatpush3.bf16.msra.mxu0 %v3245_v42  ;;  %2774 = vmatpush3.bf16.msra.mxu1 %v3246_v43 }
 0x153   :  { %2753 = vmatprep.subr.bf16.mxu0 %v3247_v44  ;;  %2775 = vmatprep.subr.bf16.mxu1 %v3248_v45  ;;  %v2379_v44 = vld [vmem:[%s3486_s5] sm:$0xf]  ;;  %v2422_v45 = vstv %s3487_s6 }
 0x156   :  { %2754 = vmatpush3.bf16.msra.mxu0 %v3249_v46  ;;  %2776 = vmatpush3.bf16.msra.mxu1 %v3250_v47 }
 0x157   :  { %2785 = vmatprep.subr.bf16.mxu0 %v3354_v14 }
 0x20c   :  { %v1839_v59 = vpop.f32.mrb[0].mxu0  ;;  %v2011_v60 = vpop.f32.mrb[0].mxu1 }
 0x20d   :  { %v2791_v61 = vadd.f32 %v1839_v59, %v339_v55  ;;  %v2795_v62 = vadd.f32 %v2011_v60, %v347_v56  ;;  %v1841_v63 = vpop.f32.mrb[1].mxu0  ;;  %v2013_v0 = vpop.f32.mrb[1].mxu1 }
 0x20e   :  { %v2792_v1 = vadd.f32 %v1841_v63, %v343_v57  ;;  %v2796_v2 = vadd.f32 %v2013_v0, %v351_v58  ;;  %v1843_v3 = vpop.f32.mrb[2].mxu0  ;;  %v2015_v4 = vpop.f32.mrb[2].mxu1 }
 0x20f   :  { %v2793_v5 = vadd.f32 %v1843_v3, %v339_v55  ;;  %v2797_v6 = vadd.f32 %v2015_v4, %v347_v56  ;;  %v1845_v7 = vpop.f32.mrb[3].mxu0  ;;  %v2017_v8 = vpop.f32.mrb[3].mxu1  ;;  %v2020_v11 = vmax.f32 %v2791_v61, 0.0  ;;  %v2022_v12 = vmax.f32 %v2795_v62, 0.0 }
 0x210   :  { %v2794_v9 = vadd.f32 %v1845_v7, %v343_v57  ;;  %v2798_v10 = vadd.f32 %v2017_v8, %v351_v58  ;;  %v2021_v18 = vmax.f32 %v2792_v1, 0.0  ;;  %v2023_v20 = vmax.f32 %v2796_v2, 0.0 }
 0x211   :  { %v2024_v13 = vmax.f32 %v2793_v5, 0.0  ;;  %v2026_v16 = vmax.f32 %v2797_v6, 0.0 }
 0x212   :  { %v2025_v21 = vmax.f32 %v2794_v9, 0.0  ;;  %v2027_v22 = vmax.f32 %v2798_v10, 0.0 }
 0x213   :  { %v2028_v23 = vpack.c.bf16 %v2024_v13, %v2020_v11  ;;  %v2030_v24 = vpack.c.bf16 %v2026_v16, %v2022_v12 }
 0x214   :  { %v2029_v25 = vpack.c.bf16 %v2025_v21, %v2021_v18  ;;  %v2031_v26 = vpack.c.bf16 %v2027_v22, %v2023_v20 }
 0x216   :  { %2327 = vmatprep.mubr.bf16.mxu0 %v2029_v25  ;;  %2368 = vmatprep.mubr.bf16.mxu1 %v2031_v26 }
 0x217   :  { %2328 = vmatmul.mubr.bf16.vlgmr.msra.gmra.mrb[4].mxu0 %v2028_v23  ;;  %2369 = vmatmul.mubr.bf16.vlgmr.msra.gmra.mrb[4].mxu1 %v2030_v24 }
 0x218   :  { %2787 = vmatprep.mubr.msk.bf16.mxu0 %vm3355_vm0, %v3354_v14 }
 0x2ea   :  { %v2755_v15 = vpop.f32.mrb[4].mxu0  ;;  %v2777_v27 = vpop.f32.mrb[4].mxu1 }
 0x2eb   :  { %v2756_v19 = vpop.f32.mrb[5].mxu0  ;;  %v2778_v28 = vpop.f32.mrb[5].mxu1 }
 0x2ec   :  { %v2757_v29 = vadd.f32 %v2756_v19, %v2755_v15  ;;  %v2779_v30 = vadd.f32 %v2778_v28, %v2777_v27  ;;  %v2758_v31 = vpop.f32.mrb[6].mxu0  ;;  %v2780_v32 = vpop.f32.mrb[6].mxu1 }
 0x2ed   :  { %v2759_v33 = vpop.f32.mrb[7].mxu0  ;;  %v2781_v34 = vpop.f32.mrb[7].mxu1 }
 0x2ee   :  { %v2330_v35 = vadd.f32 %v2757_v29, %v2706_v17  ;;  %v2760_v36 = vadd.f32 %v2759_v33, %v2758_v31  ;;  %v2782_v37 = vadd.f32 %v2781_v34, %v2780_v32 }
 0x2f0   :  { %v2371_v38 = vadd.f32 %v2779_v30, %v2330_v35  ;;  %v2333_v39 = vadd.f32 %v2760_v36, %v2706_v17 }
 0x2f2   :  { %v2374_v40 = vadd.f32 %v2782_v37, %v2333_v39  ;;  %v2377_v41 = vmax.f32 %v2371_v38, 0.0 }
 0x2f4   :  { %v2378_v42 = vmax.f32 %v2374_v40, 0.0 }
 0x2f6   :  { %v2380_v43 = vpack.c.bf16 %v2378_v42, %v2377_v41 }
 0x2f8   :  { %2786 = vmatpush3.bf16.xpose.msra.mxu0 %v2380_v43 }
 0x2ff   :  { %2788 = vmatmul.mubr.bf16.vlgmr.msra.gmra.mrb[8].mxu0 %v2379_v44 }
 0x3d2   :  { %v2415_v46 = vpop.f32.mrb[8].mxu0 }
 0x3d3   :  { %v2423_v47 = vadd.f32 %v2422_v45, %v2415_v46  ;;  %v2789_v48 = vpop.f32.mrb[9].mxu0 }
 0x3d4   :  { %v2418_v49 = vpop.f32.mrb[10].mxu0 }
 0x3d5   :  { %v2790_v50 = vpop.f32.mrb[11].mxu0  ;;  %2425 = vst.msk [vmem:[#allocation9] sm:$0x1] %vm2424_vm1, %v2423_v47 }
 0x3d6   :  { %3328 = shalt.err (!%p3325_p0)
}
 0x3d7   :  { %s3329_s26 = scalar_lea.hbm %s3488_s7, 16 }
 0x3d8   :  { %p3330_p1 = scmp.ne.s32.totalorder %s3488_s7, %s3329_s26  ;;  %p3333_p2 = scmp.lt.u32.totalorder %s3329_s26, %s3488_s7 }
 0x3da   :  { %p3335_p3 = pnand %p3333_p2, %p3330_p1 }
 0x3dc   :  { %3338 = shalt.err (!%p3335_p3)
}
 0x3dd   :  { %2435 = dma.vmem_to_hbm [thread:$0]  %s2433_s24, 16, %s3488_s7, [#allocation5]  }
 0x3de   :  { %3343 = dma.done.wait [#allocation5], 16  }
 0x3df   :  { %3344 = vsyncadd [#allocation5], 4294967280 }
 0x3e0   :  { %2439 = vsyncpa [#allocation4], 1 }
 0x3e1   :  { %2440 = vsyncpa [#allocation7], 1 }
 0x3e2   :  { %2441 = vsyncpa [#allocation5], 1 }

</bundles_post_ra>
